<compile_context>
chip_gen: v7x
topology: tpu7x:2x2x1
jax: 0.10.0
libtpu: 0.0.40
codegen_flags: <defaults>
</compile_context>

<pallas_src>
import functools
import math

import jax
import jax.numpy as jnp
from jax.experimental import pallas as pl
from jax.experimental.pallas import tpu as pltpu

NEG_CLAMP = -1e9   # torch.clamp(min=-1e9); -inf from masked_fill clamps to this
POS_CLAMP = 1e9    # torch.clamp(max= 1e9)

_MIN_GRID_STEPS = 4  # >= 2 steps per v7x TensorCore + prefetch/writeback overlap


# ---------------------------------------------------------------------------
# Kernel
# ---------------------------------------------------------------------------
def _sdpa_kernel(*refs, sm_scale, has_mask, return_weights):
    q_ref, k_ref, v_ref = refs[:3]
    pos = 3
    m_ref = None
    if has_mask:
        m_ref = refs[pos]
        pos += 1
    o_ref = refs[pos]
    pos += 1
    w_ref = refs[pos] if return_weights else None

    # Fold the 1/sqrt(d_k) scale into Q: Sq*D multiplies instead of Sq*Sk.
    q = q_ref[...] * sm_scale        # stays in the (bf16) compute dtype
    k = k_ref[...]
    v = v_ref[...]

    # MXU batched matmul with f32 accumulation.
    scores = jnp.einsum("nqd,nkd->nqk", q, k,
                        preferred_element_type=jnp.float32)

    # torch.clamp(scores, -1e9, 1e9). Applying it before the mask write is
    # equivalent to the reference order because masked positions get exactly
    # -1e9 below (masked_fill(-inf) then clamp). Kept for spec fidelity; the
    # VPU has slack in this HBM-bound kernel, so it is effectively free.
    scores = jnp.clip(scores, NEG_CLAMP, POS_CLAMP)

    if m_ref is not None:
        # mask ref holds int8 "keep" flags; 0 -> -inf -> clamp -> -1e9.
        scores = jnp.where(m_ref[...] != 0, scores, NEG_CLAMP)

    # Numerically stable softmax in f32 with exact normalization so the
    # returned attention weights closely match torch.softmax.
    scores = scores - jnp.max(scores, axis=-1, keepdims=True)
    p = jnp.exp(scores)
    p = p / jnp.sum(p, axis=-1, keepdims=True)

    out = jnp.einsum("nqk,nkd->nqd", p.astype(v.dtype), v,
                     preferred_element_type=jnp.float32)

    o_ref[...] = out.astype(o_ref.dtype)
    if w_ref is not None:
        w_ref[...] = p.astype(w_ref.dtype)


# ---------------------------------------------------------------------------
# Wrapper
# ---------------------------------------------------------------------------
def _vmem_limit_and_budget():
    """Per-generation VMEM limit + per-step working-set budget."""
    cap = 64 * 1024 * 1024                       # conservative fallback (v7x per-TC)
    try:
        cap = int(pltpu.get_tpu_info().vmem_capacity_bytes)
    except Exception:
        pass
    # Leave headroom for Mosaic internals; ~48 MiB on v7x, ~112 MiB on v5e/v6e.
    limit = max(32 * 1024 * 1024, min(cap - 16 * 1024 * 1024, 112 * 1024 * 1024))
    budget = int(limit * 0.70)                   # explicit per-step estimate must fit
    return limit, budget


def scaled_dot_product_attention(Q, K, V, mask=None, *,
                                 return_weights=True,
                                 weights_dtype=None,
                                 compute_dtype=jnp.bfloat16):
    """Q: (..., Sq, D), K: (..., Sk, D), V: (..., Sk, Dv).

    Returns (output (..., Sq, Dv), attention_weights (..., Sq, Sk)); if
    `return_weights=False`, returns only the output (saves the largest HBM
    write stream)."""
    *lead, Sq, D = Q.shape
    Sk = K.shape[-2]
    Dv = V.shape[-1]
    lead = tuple(lead)
    N = int(math.prod(lead)) if lead else 1

    out_dtype = Q.dtype
    w_dtype = out_dtype if weights_dtype is None else jnp.dtype(weights_dtype)

    # bf16 operands: halves Q/K/V HBM->VMEM traffic; f32 accumulation in-kernel.
    q = Q.reshape(N, Sq, D).astype(compute_dtype)
    k = K.reshape(N, Sk, D).astype(compute_dtype)
    v = V.reshape(N, Sk, Dv).astype(compute_dtype)

    # ---- mask preprocessing (exact PyTorch reference semantics) -------------
    #   bool mask:     attend where mask is True
    #   non-bool mask: mask = (mask == 0); masked_fill(mask == 0, -inf)
    #                  => attend where the ORIGINAL numeric mask was 0.
    has_mask = mask is not None
    mask_op = None
    mask_kind = None          # "full" | "single" | "per_batch"
    H_rest = 1
    if has_mask:
        keep = (mask == 0) if mask.dtype != jnp.bool_ else mask
        keep = jnp.asarray(keep, jnp.int8)            # 1 byte/elem on the HBM wire
        full_rank = len(lead) + 2
        if keep.ndim > full_rank:
            raise ValueError("mask rank exceeds scores rank")
        if keep.ndim < full_rank:
            keep = keep.reshape((1,) * (full_rank - keep.ndim) + keep.shape)
        keep = jnp.broadcast_to(keep, keep.shape[:-2] + (Sq, Sk))
        mlead = keep.shape[:-2]
        for md, ld in zip(mlead, lead):
            if md not in (1, ld):
                raise ValueError(f"mask shape {mask.shape} not broadcastable to scores")
        trailing_shared = all(d == 1 for d in mlead[1:])
        if trailing_shared and (len(mlead) == 0 or mlead[0] == 1):
            mask_kind, mask_op = "single", keep.reshape(1, Sq, Sk)
        elif trailing_shared and mlead[0] == lead[0] and N // lead[0] > 1:
            # Mask varies only with the batch dim: one copy per batch, re-used
            # across heads by the index_map (no H-fold HBM duplication/traffic).
            mask_kind, H_rest = "per_batch", N // lead[0]
            mask_op = keep.reshape(lead[0], Sq, Sk)
        else:
            mask_kind = "full"
            mask_op = jnp.broadcast_to(keep, lead + (Sq, Sk)).reshape(N, Sq, Sk)

    # ---- tile size: honest per-step VMEM accounting --------------------------
    in_b = jnp.dtype(compute_dtype).itemsize
    out_b = jnp.dtype(out_dtype).itemsize
    w_b = jnp.dtype(w_dtype).itemsize if return_weights else 0

    def step_bytes(nb):
        b = 2 * nb * (Sq * D + Sk * D + Sk * Dv) * in_b   # q,k,v tiles (double-buffered)
        b += 2 * nb * Sq * Dv * out_b                     # out tile (double-buffered)
        if return_weights:
            b += 2 * nb * Sq * Sk * w_b                   # attn tile (double-buffered)
        if has_mask:
            m_rows = nb if mask_kind == "full" else 1
            b += 2 * m_rows * Sq * Sk                     # int8 mask tile
        # in-kernel intermediates: f32 scores + f32 probs + bf16 prob copy + f32 out acc
        b += nb * Sq * Sk * (4 + 4 + 2) + nb * Sq * Dv * 4
        return b

    vmem_limit, budget = _vmem_limit_and_budget()
    max_nb = max(1, N // _MIN_GRID_STEPS)                 # keep >= 4 grid steps
    nb = 1
    for cand in range(1, max_nb + 1):
        if N % cand:
            continue
        if mask_kind == "per_batch" and H_rest % cand:
            continue                                      # block must not straddle batches
        if step_bytes(cand) <= budget:
            nb = cand
    grid = (N // nb,)

    # ---- specs ---------------------------------------------------------------
    def tile(s1, s2):
        return pl.BlockSpec((nb, s1, s2), lambda i: (i, 0, 0))

    operands = [q, k, v]
    in_specs = [tile(Sq, D), tile(Sk, D), tile(Sk, Dv)]
    if has_mask:
        operands.append(mask_op)
        if mask_kind == "full":
            in_specs.append(pl.BlockSpec((nb, Sq, Sk), lambda i: (i, 0, 0)))
        elif mask_kind == "single":
            in_specs.append(pl.BlockSpec((1, Sq, Sk), lambda i: (0, 0, 0)))
        else:  # per_batch: map the flat (batch*head) block back to its batch row
            _nb, _h = nb, H_rest
            in_specs.append(pl.BlockSpec((1, Sq, Sk),
                                         lambda i: ((i * _nb) // _h, 0, 0)))

    out_specs = [tile(Sq, Dv)]
    out_shape = [jax.ShapeDtypeStruct((N, Sq, Dv), out_dtype)]
    if return_weights:
        out_specs.append(tile(Sq, Sk))
        out_shape.append(jax.ShapeDtypeStruct((N, Sq, Sk), w_dtype))

    kernel = functools.partial(_sdpa_kernel,
                               sm_scale=1.0 / math.sqrt(D),
                               has_mask=has_mask,
                               return_weights=return_weights)

    # TODO(synk): for very long Sk on 64 MiB-VMEM parts (v7x), add a flash-style
    # K/V grid axis (online softmax) for the return_weights=False path, and fold
    # heads into the lane axis when Dv < 128 for lane-dense output stores.
    results = pl.pallas_call(
        kernel,
        grid=grid,
        in_specs=in_specs,
        out_specs=tuple(out_specs),
        out_shape=tuple(out_shape),
        compiler_params=pltpu.CompilerParams(
            dimension_semantics=("parallel",),
            vmem_limit_bytes=vmem_limit),
    )(*operands)

    out = results[0].reshape(lead + (Sq, Dv))
    if not return_weights:
        return out
    attn = results[1].reshape(lead + (Sq, Sk))
    return out, attn


# ---------------------------------------------------------------------------
if __name__ == "__main__":
    B, H, S, D = 2, 4, 8, 32
    key = jax.random.PRNGKey(0)
    kq, kk, kv, km = jax.random.split(key, 4)
    Q = jax.random.normal(kq, (B, H, S, D), jnp.float32)
    K = jax.random.normal(kk, (B, H, S, D), jnp.float32)
    V = jax.random.normal(kv, (B, H, S, D), jnp.float32)

    def reference(Q, K, V, mask=None):
        d_k = Q.shape[-1]
        scores = jnp.einsum("...qd,...kd->...qk", Q, K,
                            precision=jax.lax.Precision.HIGHEST) / math.sqrt(d_k)
        if mask is not None:
            m = mask if mask.dtype == jnp.bool_ else (mask == 0)
            scores = jnp.where(m, scores, -jnp.inf)   # masked_fill(mask == 0, -inf)
        scores = jnp.clip(scores, -1e9, 1e9)
        w = jax.nn.softmax(scores, axis=-1)
        out = jnp.einsum("...qk,...kd->...qd", w, V,
                         precision=jax.lax.Precision.HIGHEST)
        return out, w

    def check(got, want, name, atol=5e-2):
        err = float(jnp.max(jnp.abs(got.astype(jnp.float32) - want.astype(jnp.float32))))
        assert err < atol, f"{name}: max abs err {err}"

    # 1) mask=None (module default)
    out, attn = jax.block_until_ready(scaled_dot_product_attention(Q, K, V))
    assert out.shape == (B, H, S, D) and attn.shape == (B, H, S, S)
    ro, rw = reference(Q, K, V)
    check(out, ro, "out/no-mask"); check(attn, rw, "attn/no-mask")

    # 2) bool mask, full (B,H,S,S): True = attend
    bmask = jax.random.bernoulli(km, 0.8, (B, H, S, S))
    out_b, attn_b = jax.block_until_ready(
        scaled_dot_product_attention(Q, K, V, mask=bmask))
    ro, rw = reference(Q, K, V, bmask)
    check(out_b, ro, "out/bool"); check(attn_b, rw, "attn/bool")

    # 3) bool mask broadcast over heads (B,1,S,S): exercises per-batch mask reuse
    hmask = bmask[:, :1]
    out_h, attn_h = jax.block_until_ready(
        scaled_dot_product_attention(Q, K, V, mask=hmask))
    ro, rw = reference(Q, K, V, hmask)
    check(out_h, ro, "out/head-shared"); check(attn_h, rw, "attn/head-shared")

    # 4) non-bool mask: reference attends where the original value is 0
    imask = bmask.astype(jnp.int32)
    out_i, attn_i = jax.block_until_ready(
        scaled_dot_product_attention(Q, K, V, mask=imask))
    ro, rw = reference(Q, K, V, imask)
    check(out_i, ro, "out/int"); check(attn_i, rw, "attn/int")

    print("KERNEL_OK")
</pallas_src>

<mosaic_0001>
module attributes {stable_mosaic.version = 11 : i64} {
  func.func @_sdpa_kernel(%arg0: i32, %arg1: memref<2x8x32xbf16, #tpu.memory_space<vmem>>, %arg2: memref<2x8x32xbf16, #tpu.memory_space<vmem>>, %arg3: memref<2x8x32xbf16, #tpu.memory_space<vmem>>, %arg4: memref<2x8x32xf32, #tpu.memory_space<vmem>>, %arg5: memref<2x8x8xf32, #tpu.memory_space<vmem>>) attributes {dimension_semantics = [#tpu.dimension_semantics<parallel>], iteration_bounds = array<i64: 4>, scalar_prefetch = 0 : i64, scratch_operands = 0 : i64, tpu.core_type = #tpu.core_type<tc>, window_params = [{transform_indices = @transform_0, window_bounds = array<i64: 2, 8, 32>}, {transform_indices = @transform_1, window_bounds = array<i64: 2, 8, 32>}, {transform_indices = @transform_2, window_bounds = array<i64: 2, 8, 32>}, {transform_indices = @transform_3, window_bounds = array<i64: 2, 8, 32>}, {transform_indices = @transform_4, window_bounds = array<i64: 2, 8, 8>}]} {
    %c0 = arith.constant 0 : index
    %c0_0 = arith.constant 0 : index
    %c0_1 = arith.constant 0 : index
    %0 = vector.load %arg1[%c0, %c0_0, %c0_1] : memref<2x8x32xbf16, #tpu.memory_space<vmem>>, vector<2x8x32xbf16>
    %cst = arith.constant 1.767580e-01 : bf16
    %1 = vector.broadcast %cst : bf16 to vector<2x8x32xbf16>
    %2 = arith.mulf %0, %1 : vector<2x8x32xbf16>
    %c0_2 = arith.constant 0 : index
    %c0_3 = arith.constant 0 : index
    %c0_4 = arith.constant 0 : index
    %3 = vector.load %arg2[%c0_2, %c0_3, %c0_4] : memref<2x8x32xbf16, #tpu.memory_space<vmem>>, vector<2x8x32xbf16>
    %c0_5 = arith.constant 0 : index
    %c0_6 = arith.constant 0 : index
    %c0_7 = arith.constant 0 : index
    %4 = vector.load %arg3[%c0_5, %c0_6, %c0_7] : memref<2x8x32xbf16, #tpu.memory_space<vmem>>, vector<2x8x32xbf16>
    "tpu.trace_start"() <{level = 10 : i32, message = "nqd,nkd->nqk"}> : () -> ()
    %cst_8 = arith.constant dense<0.000000e+00> : vector<2x8x8xf32>
    %5 = tpu.matmul %2, %3, %cst_8 {dimension_numbers = #tpu.dot_dimension_numbers<[2], [2], [1], [1], [0, 0, 0, 1, 1, 1], [0], [0]>} : vector<2x8x32xbf16>, vector<2x8x32xbf16>, vector<2x8x8xf32> -> vector<2x8x8xf32>
    %cst_9 = arith.constant -1.000000e+09 : f32
    %cst_10 = arith.constant 1.000000e+09 : f32
    "tpu.trace_stop"() : () -> ()
    %6 = vector.broadcast %cst_9 : f32 to vector<2x8x8xf32>
    %7 = arith.maximumf %6, %5 : vector<2x8x8xf32>
    %8 = vector.broadcast %cst_10 : f32 to vector<2x8x8xf32>
    %9 = arith.minimumf %8, %7 : vector<2x8x8xf32>
    %cst_11 = arith.constant dense<0xFF800000> : vector<2x8xf32>
    %10 = vector.multi_reduction <maximumf>, %9, %cst_11 [2] : vector<2x8x8xf32> to vector<2x8xf32>
    %11 = vector.shape_cast %10 : vector<2x8xf32> to vector<2x8x1xf32>
    %12 = vector.broadcast %11 : vector<2x8x1xf32> to vector<2x8x8xf32>
    %13 = arith.subf %9, %12 : vector<2x8x8xf32>
    %14 = math.exp %13 : vector<2x8x8xf32>
    %cst_12 = arith.constant dense<0.000000e+00> : vector<2x8xf32>
    %15 = vector.multi_reduction <add>, %14, %cst_12 [2] : vector<2x8x8xf32> to vector<2x8xf32>
    %16 = vector.shape_cast %15 : vector<2x8xf32> to vector<2x8x1xf32>
    %17 = vector.broadcast %16 : vector<2x8x1xf32> to vector<2x8x8xf32>
    %18 = arith.divf %14, %17 : vector<2x8x8xf32>
    %19 = arith.truncf %18 : vector<2x8x8xf32> to vector<2x8x8xbf16>
    "tpu.trace_start"() <{level = 10 : i32, message = "nqk,nkd->nqd"}> : () -> ()
    %cst_13 = arith.constant dense<0.000000e+00> : vector<2x8x32xf32>
    %20 = tpu.matmul %19, %4, %cst_13 {dimension_numbers = #tpu.dot_dimension_numbers<[2], [1], [1], [2], [0, 0, 0, 1, 1, 2], [0], [0]>} : vector<2x8x8xbf16>, vector<2x8x32xbf16>, vector<2x8x32xf32> -> vector<2x8x32xf32>
    "tpu.trace_stop"() : () -> ()
    %c0_14 = arith.constant 0 : index
    %c0_15 = arith.constant 0 : index
    %c0_16 = arith.constant 0 : index
    %21 = vector.load %arg4[%c0_14, %c0_15, %c0_16] : memref<2x8x32xf32, #tpu.memory_space<vmem>>, vector<2x8x32xf32>
    tpu.vector_store %arg4[%c0_14, %c0_15, %c0_16], %20 {strides = array<i32>} : memref<2x8x32xf32, #tpu.memory_space<vmem>>, vector<2x8x32xf32>,
    %c0_17 = arith.constant 0 : index
    %c0_18 = arith.constant 0 : index
    %c0_19 = arith.constant 0 : index
    %22 = vector.load %arg5[%c0_17, %c0_18, %c0_19] : memref<2x8x8xf32, #tpu.memory_space<vmem>>, vector<2x8x8xf32>
    tpu.vector_store %arg5[%c0_17, %c0_18, %c0_19], %18 {strides = array<i32>} : memref<2x8x8xf32, #tpu.memory_space<vmem>>, vector<2x8x8xf32>,
    return
  }
  func.func @transform_0(%arg0: i32) -> (i32, i32, i32) {
    %c0_i32 = arith.constant 0 : i32
    %c0_i32_0 = arith.constant 0 : i32
    %c0_i32_1 = arith.constant 0 : i32
    return %arg0, %c0_i32, %c0_i32_0 : i32, i32, i32
  }
  func.func @transform_1(%arg0: i32) -> (i32, i32, i32) {
    %c0_i32 = arith.constant 0 : i32
    %c0_i32_0 = arith.constant 0 : i32
    %c0_i32_1 = arith.constant 0 : i32
    return %arg0, %c0_i32, %c0_i32_0 : i32, i32, i32
  }
  func.func @transform_2(%arg0: i32) -> (i32, i32, i32) {
    %c0_i32 = arith.constant 0 : i32
    %c0_i32_0 = arith.constant 0 : i32
    %c0_i32_1 = arith.constant 0 : i32
    return %arg0, %c0_i32, %c0_i32_0 : i32, i32, i32
  }
  func.func @transform_3(%arg0: i32) -> (i32, i32, i32) {
    %c0_i32 = arith.constant 0 : i32
    %c0_i32_0 = arith.constant 0 : i32
    %c0_i32_1 = arith.constant 0 : i32
    return %arg0, %c0_i32, %c0_i32_0 : i32, i32, i32
  }
  func.func @transform_4(%arg0: i32) -> (i32, i32, i32) {
    %c0_i32 = arith.constant 0 : i32
    %c0_i32_0 = arith.constant 0 : i32
    %c0_i32_1 = arith.constant 0 : i32
    return %arg0, %c0_i32, %c0_i32_0 : i32, i32, i32
  }
}

</mosaic_0001>

<bundles_post_ra>
// kernel: tpu_custom_call.1
= control target key start
LH: loop header
LB: loop body
LE: loop exit
PB: predicated region body
PF: predicated region fallthrough
CT: control target
= control target key end

     0   :  { %s1417_s0 = inlined_call_operand.hbm [shape: bf16[8,8,32], index: 0, kind: input, shape index: {}]   ;;  %s1418_s1 = inlined_call_operand.hbm [shape: bf16[8,8,32], index: 1, kind: input, shape index: {}]   ;;  %s1419_s2 = inlined_call_operand.hbm [shape: bf16[8,8,32], index: 2, kind: input, shape index: {}]   ;;  %s1420_s3 = inlined_call_operand.hbm [shape: f32[8,8,32], index: 3, kind: output, shape index: {0}]   ;;  %s1421_s4 = inlined_call_operand.hbm [shape: f32[8,8,8], index: 4, kind: output, shape index: {1}]  }
   0x1   :  { %1428 = sst [smem:[#allocation15_spill]] %s1417_s0 }
   0x2   :  { %1429 = sst [smem:[#allocation16_spill]] %s1418_s1 }
   0x3   :  { %10 = vsyncpa [#allocation3], 0 }
   0x4   :  { %12 = vsyncpa [#allocation3 + $0x1], 0 }
   0x5   :  { %13 = vsyncpa [#allocation6], 0 }
   0x6   :  { %15 = vsyncpa [#allocation6 + $0x1], 0 }
   0x7   :  { %16 = vsyncpa [#allocation4], 0 }
   0x8   :  { %18 = vsyncpa [#allocation4 + $0x1], 0 }
   0x9   :  { %19 = vsyncpa [#allocation10], 0 }
   0xa   :  { %21 = vsyncpa [#allocation10 + $0x1], 0  ;;  %s1095_s15 = smov 0   ;;  %s1097_s16 = smov 0  }
   0xb   :  { %s1099_s17 = smov 0   ;;  %s1101_s18 = smov 0  }
   0xc LB: > { %s1116_s19 = sadd.s32 4294967295, %s1057_s18   ;;  %s721_s20 = sadd.s32 4294967294, %s1057_s18   ;;  %s1057_s18 = sphi %s1101_s18, %s1448_s18   ;;  %s1053_s17 = sphi %s1099_s17, %s1447_s17   ;;  %s1049_s16 = sphi %s1097_s16, %s1446_s16   ;;  %s1045_s15 = sphi %s1095_s15, %s1445_s15  }
   0xd   : > { %s1120_s21 = sadd.s32 1, %s1057_s18   ;;  %s34_s22 = sadd.s32 1, %s1053_s17 }
   0xe   : > { %s31_s23 = ssub.s32 %s1057_s18, %s1120_s21  ;;  %p41_p0 = scmp.ne.s32.totalorder %s1053_s17, %s1049_s16 }
   0xf   : > { %p32_p1 = scmp.eq.s32.totalorder %s31_s23, 0  ;;  %p42_p2 = scmp.eq.s32.totalorder %s1057_s18, 0 }
  0x10   : > { %p47_p3 = scmp.ne.s32.totalorder %s1049_s16, %s1045_s15  ;;  %p48_p4 = scmp.eq.s32.totalorder %s1116_s19, 0 }
  0x11   : > { %s1132_s24 = scalar_select %p32_p1, %s1053_s17, %s34_s22  }
  0x12   : > { %p43_p5 = por %p42_p2, %p41_p0  ;;  %p1134_p6 = por %p48_p4, %p47_p3 }
  0x13   : > { %p123_p7 = scmp.eq.s32.totalorder %s1116_s19, 3  ;;  %p129_p8 = scmp.eq.s32.totalorder %s721_s20, 3 }
  0x14   : > { %s1430_s25 = scalar_select %p1134_p6, 1, 0 }
  0x15   : > { %p817_p9 = scmp.lt.s32.totalorder %s1057_s18, 4  ;;  %p1140_p10 = por %p123_p7, %p41_p0 }
  0x16   : > { %p1144_p11 = por %p129_p8, %p47_p3  ;;  %s175_s28 = sand.u32 1, %s1053_s17  }
  0x17   : > { %s1431_s26 = scalar_select %p1140_p10, 1, 0 }
  0x18   : > { %s1432_s27 = scalar_select %p1144_p11, 1, 0 }
  0x19   : > { %s1150_s29 = sshll.u32 %s1057_s18, 7  ;;  %s1154_s30 = sshll.u32 %s175_s28, 3 }
  0x1a   : > { %p1156_p12 = pnand %p817_p9, %p43_p5  ;;  %s196_s6 = sand.u32 1, %s1057_s18  }
  0x1b   : > { %s1434_s1 = sld [smem:[#allocation16_spill]]  ;;  %s200_s10 = scalar_lea.vmem [#allocation5], %s1154_s30 }
  0x1c   : > { %s207_s11 = sshll.u32 %s200_s10, 4  ;;  %s1171_s12 = scalar_lea.sflag [#allocation6], %s196_s6  ;;  %s1168_s11 = int_to_ptr.vmem [resolvable:$true] %s207_s11 }
  0x1d   : > { %p1177_p1 = pneg %p1156_p12 }
  0x21   : > { %s1165_s9 = scalar_lea.hbm %s1434_s1, %s1150_s29  ;;  %s870_s23 = scalar_lea.hbm %s1434_s1, 512 }
  0x22   : > { %s865_s13 = scalar_lea.hbm %s1165_s9, 128  ;;  %p871_p4 = scmp.lt.u32.totalorder %s1165_s9, %s1434_s1 }
  0x23   : > { %p866_p0 = scmp.ne.s32.totalorder %s1165_s9, %s865_s13  ;;  %p872_p5 = scmp.lt.u32.totalorder %s870_s23, %s865_s13 }
  0x24   : > { %p874_p8 = scmp.lt.u32.totalorder %s865_s13, %s1165_s9 }
  0x25   : > { %p868_p2 = pnand %p1177_p1, %p866_p0  ;;  %p873_p7 = por %p872_p5, %p871_p4 }
  0x27   : > { %p869_p3 = pneg %p868_p2  ;;  %p875_p9 = por %p874_p8, %p873_p7 }
  0x29   : > { %p876_p13 = pnand %p875_p9, %p869_p3 }
  0x2b   : > { %879 = shalt.err (!%p876_p13)
}
  0x2c   : > { %s880_s6 = scalar_lea.vmem %s1168_s11, 128  ;;  %s1059_s10 = smov [#allocation5]  }
  0x2d   : > { %p881_p0 = scmp.ne.s32.totalorder %s1168_s11, %s880_s6  ;;  %s885_s20 = sshll.u32 %s1059_s10, 4  ;;  %s886_s20 = int_to_ptr.vmem [resolvable:$false] %s885_s20 }
  0x2e   : > { %s887_s22 = scalar_lea.vmem %s886_s20, 256  ;;  %p888_p10 = scmp.lt.s32.totalorder %s1168_s11, %s886_s20 }
  0x2f   : > { %p883_p2 = pnand %p881_p0, %p1177_p1  ;;  %p889_p6 = scmp.lt.s32.totalorder %s887_s22, %s880_s6 }
  0x31   : > { %p884_p11 = pneg %p883_p2  ;;  %p890_p4 = por %p889_p6, %p888_p10 }
  0x33   : > { %p891_p5 = pnand %p890_p4, %p884_p11 }
  0x35   : > { %894 = shalt.err (!%p891_p5)
}
  0x36   : > { %s1424_s13 = smov 64   ;;  %s1426_s23 = smov 4  }
  0x37   : > { %806 = dma.hbm_to_vmem [thread:$0]  (!%p1156_p12), %s1165_s9, 128, %s1168_s11, %s1171_s12, %s1424_s13, %s1424_s13, %s1426_s23  }
  0x38   : > { %p236_p6 = scmp.lt.s32.totalorder %s1057_s18, 5  ;;  %s1436_s0 = sld [smem:[#allocation15_spill]] }
  0x39   : > { %p1437_p10 = scmp.ge.s32.totalorder %s1057_s18, 1  ;;  %s179_s20 = scalar_lea.vmem [#allocation2], %s1154_s30 }
  0x3a   : > { %s186_s22 = sshll.u32 %s179_s20, 4  ;;  %s1222_s9 = scalar_lea.sflag [#allocation3], %s175_s28  ;;  %s1218_s22 = int_to_ptr.vmem [resolvable:$true] %s186_s22 }
  0x3b   : > { %p1213_p11 = pnand %p1437_p10, %p236_p6 }
  0x3d   : > { %s1438_s10 = scalar_select %p1213_p11, 1, 0 }
  0x3e   : > { %s1209_s6 = scalar_lea.hbm %s1436_s0, %s1150_s29  ;;  %s900_s13 = scalar_lea.hbm %s1436_s0, 512 }
  0x3f   : > { %s895_s11 = scalar_lea.hbm %s1209_s6, 128  ;;  %p901_p8 = scmp.lt.u32.totalorder %s1209_s6, %s1436_s0 }
  0x40   : > { %p896_p13 = scmp.ne.s32.totalorder %s1209_s6, %s895_s11  ;;  %p902_p9 = scmp.lt.u32.totalorder %s900_s13, %s895_s11 }
  0x41   : > { %p904_p2 = scmp.lt.u32.totalorder %s895_s11, %s1209_s6 }
  0x42   : > { %p898_p3 = pnand %p896_p13, %p1177_p1  ;;  %p903_p0 = por %p902_p9, %p901_p8 }
  0x44   : > { %p899_p7 = pneg %p898_p3  ;;  %p905_p4 = por %p904_p2, %p903_p0 }
  0x46   : > { %p906_p5 = pnand %p905_p4, %p899_p7 }
  0x48   : > { %909 = shalt.err (!%p906_p5)
}
  0x49   : > { %s910_s28 = scalar_lea.vmem %s1218_s22, 128  ;;  %s1062_s20 = smov [#allocation2]  }
  0x4a   : > { %p911_p6 = scmp.ne.s32.totalorder %s1218_s22, %s910_s28  ;;  %s915_s7 = sshll.u32 %s1062_s20, 4  ;;  %s916_s7 = int_to_ptr.vmem [resolvable:$false] %s915_s7 }
  0x4b   : > { %s917_s1 = scalar_lea.vmem %s916_s7, 256  ;;  %p918_p3 = scmp.lt.s32.totalorder %s1218_s22, %s916_s7 }
  0x4c   : > { %p913_p10 = pnand %p911_p6, %p1177_p1  ;;  %p919_p11 = scmp.lt.s32.totalorder %s917_s1, %s910_s28 }
  0x4e   : > { %p914_p13 = pneg %p913_p10  ;;  %p920_p8 = por %p919_p11, %p918_p3 }
  0x50   : > { %p921_p9 = pnand %p920_p8, %p914_p13 }
  0x52   : > { %924 = shalt.err (!%p921_p9)
}
  0x53   : > { %s1439_s13 = smov 4   ;;  %s1440_s23 = smov 64  }
  0x54   : > { %803 = dma.hbm_to_vmem [thread:$0]  (!%p1156_p12), %s1209_s6, 128, %s1218_s22, %s1222_s9, %s1440_s23, %s1440_s23, %s1439_s13  }
  0x55   : > { %s1253_s20 = scalar_lea.hbm %s1419_s2, %s1150_s29  ;;  %s221_s28 = scalar_lea.vmem [#allocation7], %s1154_s30 }
  0x56   : > { %s228_s7 = sshll.u32 %s221_s28, 4  ;;  %s925_s1 = scalar_lea.hbm %s1253_s20, 128  ;;  %s1256_s7 = int_to_ptr.vmem [resolvable:$true] %s228_s7 }
  0x57   : > { %p926_p11 = scmp.ne.s32.totalorder %s1253_s20, %s925_s1  ;;  %s930_s22 = scalar_lea.hbm %s1419_s2, 512 }
  0x58   : > { %p931_p2 = scmp.lt.u32.totalorder %s1253_s20, %s1419_s2  ;;  %p932_p4 = scmp.lt.u32.totalorder %s930_s22, %s925_s1 }
  0x59   : > { %p928_p7 = pnand %p926_p11, %p1177_p1  ;;  %p934_p6 = scmp.lt.u32.totalorder %s925_s1, %s1253_s20 }
  0x5a   : > { %p933_p5 = por %p932_p4, %p931_p2 }
  0x5b   : > { %p929_p0 = pneg %p928_p7 }
  0x5c   : > { %p935_p10 = por %p934_p6, %p933_p5 }
  0x5e   : > { %p936_p13 = pnand %p935_p10, %p929_p0 }
  0x60   : > { %939 = shalt.err (!%p936_p13)
}
  0x61   : > { %s940_s30 = scalar_lea.vmem %s1256_s7, 128  ;;  %s1063_s0 = smov [#allocation7]  }
  0x62   : > { %p941_p3 = scmp.ne.s32.totalorder %s1256_s7, %s940_s30  ;;  %s945_s11 = sshll.u32 %s1063_s0, 4  ;;  %s946_s11 = int_to_ptr.vmem [resolvable:$false] %s945_s11 }
  0x63   : > { %s947_s8 = scalar_lea.vmem %s946_s11, 256  ;;  %p948_p11 = scmp.lt.s32.totalorder %s1256_s7, %s946_s11 }
  0x64   : > { %p943_p8 = pnand %p941_p3, %p1177_p1  ;;  %p949_p7 = scmp.lt.s32.totalorder %s947_s8, %s940_s30 }
  0x66   : > { %p944_p9 = pneg %p943_p8  ;;  %p950_p2 = por %p949_p7, %p948_p11 }
  0x68   : > { %p951_p4 = pnand %p950_p2, %p944_p9 }
  0x6a   : > { %954 = shalt.err (!%p951_p4)
}
  0x6b   : > { %809 = dma.hbm_to_vmem [thread:$0]  (!%p1156_p12), %s1253_s20, 128, %s1256_s7, %s1171_s12, %s1440_s23, %s1440_s23, %s1439_s13  }
  0x6c   : > { %p1441_p1 = scmp.ne.s32.totalorder %s1438_s10, 0 }
  0x6d   : > { %s1286_s14 = sand.u32 (!%p1441_p1), 1, %s1049_s16   ;;  %p1442_p0 = scmp.ne.s32.totalorder (!%p1441_p1), %s1430_s25, 0 }
  0x6e   : > { %240 = sbr.rel (%p1441_p1) target bundleno = 892 (0x37c), region = 32  ;;  %s1289_s28 = sshll.u32 (!%p1441_p1), %s1286_s14, 3 }
  0x6f   : > { %s243_s5 = scalar_lea.sflag (!%p1441_p1), [#allocation3], %s1286_s14  ;;  %s246_s1 = scalar_lea.vmem (!%p1441_p1), [#allocation2], %s1289_s28 }
  0x75   : > { %1028 = dma.done.wait (%p1442_p0), %s243_s5, 128  }
  0x76   : > { %1030 = vsyncadd (%p1442_p0), %s243_s5, 4294967168  ;;  %s251_s12 = sand.u32 1, %s1116_s19   ;;  %s255_s13 = scalar_lea.vmem [#allocation5], %s1289_s28 }
  0x77   : > { %s252_s10 = scalar_lea.sflag [#allocation6], %s251_s12 }
  0x78   : > { %1032 = dma.done.wait (%p1442_p0), %s252_s10, 256  }
  0x79   : > { %1034 = vsyncadd (%p1442_p0), %s252_s10, 4294967040  ;;  %v1064_v0 = vmov 0.0   ;;  %vm1065_vm0 = vmmov 0   ;;  %vm319_vm1 = vcmask 261120   ;;  %v315_v1 = vld [vmem:[%s255_s13] sm:$0xf] }
  0x7a   : > { %766 = vmatprep.subr.bf16.mxu0 %v1064_v0  ;;  %772 = vmatprep.subr.bf16.mxu1 %v1064_v0  ;;  %v316_v2 = vld [vmem:[%s255_s13 + $0x4] sm:$0xf]  ;;  %v324_v3 = vsel %vm319_vm1, %v315_v1, 0  ;;  %v311_v5 = vld [vmem:[%s246_s1] sm:$0xf]  ;;  %vm416_vm2 = vcmask 64512  }
  0x7b   : > { %768 = vmatprep.mubr.msk.bf16.mxu0 %vm1065_vm0, %v1064_v0  ;;  %774 = vmatprep.mubr.msk.bf16.mxu1 %vm1065_vm0, %v1064_v0  ;;  %v370_v4 = vsel %vm319_vm1, %v316_v2, 0  ;;  %v312_v6 = vld [vmem:[%s246_s1 + $0x4] sm:$0xf]  ;;  %v313_v7 = vmul.bf16 1043676725, %v311_v5  ;;  %s264_s25 = scalar_lea.vmem [#allocation7], %s1289_s28 }
  0x7c   : > { %767 = vmatpush3.bf16.xpose.msra.mxu0 %v324_v3  ;;  %773 = vmatpush3.bf16.xpose.msra.mxu1 %v370_v4  ;;  %v314_v8 = vmul.bf16 1043676725, %v312_v6  ;;  %v317_v31 = vld [vmem:[%s264_s25] sm:$0xf]  ;;  %vm444_vm3 = vcmask 1043456   ;;  %s737_s23 = sshll.u32 %s1286_s14, 4 }
  0x7d   : > { %778 = vmatprep.subr.bf16.mxu0 %v1064_v0  ;;  %784 = vmatprep.subr.bf16.mxu1 %v1064_v0  ;;  %v446_v32 = vsel %vm444_vm3, %v317_v31, 0  ;;  %v318_v33 = vld [vmem:[%s264_s25 + $0x4] sm:$0xf]  ;;  %s303_s20 = scalar_lea.vmem [#allocation9], %s737_s23  ;;  %s756_s6 = sshll.u32 %s1116_s19, 8 }
  0x7e   : > { %v492_v34 = vsel %vm444_vm3, %v318_v33, 0  ;;  %s573_s7 = sshll.u32 %s303_s20, 4  ;;  %s1331_s29 = scalar_lea.hbm %s1421_s4, %s756_s6  ;;  %s1324_s7 = int_to_ptr.vmem [resolvable:$true] %s573_s7 }
  0x7f   : > { %s544_s30 = scalar_lea.sflag [#allocation10], %s1286_s14  ;;  %s955_s0 = scalar_lea.vmem %s1324_s7, 256 }
  0x80   : > { %p956_p12 = scmp.ne.s32.totalorder %s1324_s7, %s955_s0  ;;  %p1443_p5 = scmp.ne.s32.totalorder %s1431_s26, 0 }
  0x81   : > { %s1066_s11 = smov [#allocation9]  }
  0x82   : > { %p957_p6 = pnand %p956_p12, %p1443_p5  ;;  %s959_s8 = sshll.u32 %s1066_s11, 4  ;;  %s960_s8 = int_to_ptr.vmem [resolvable:$false] %s959_s8 }
  0x83   : > { %769 = vmatmul.mubr.msk.bf16.vlgmr.msra.gmra.mrb[0].mxu0 %vm319_vm1, %v313_v7  ;;  %775 = vmatmul.mubr.msk.bf16.vlgmr.msra.gmra.mrb[0].mxu1 %vm319_vm1, %v314_v8  ;;  %s961_s28 = scalar_lea.vmem %s960_s8, 512  ;;  %p962_p13 = scmp.lt.s32.totalorder %s1324_s7, %s960_s8 }
  0x84   : > { %780 = vmatprep.mubr.msk.bf16.mxu0 %vm1065_vm0, %v1064_v0  ;;  %786 = vmatprep.mubr.msk.bf16.mxu1 %vm1065_vm0, %v1064_v0  ;;  %p958_p10 = pneg %p957_p6  ;;  %p963_p3 = scmp.lt.s32.totalorder %s961_s28, %s955_s0 }
  0x85   : > { %779 = vmatpush3.bf16.msra.mxu0 %v446_v32  ;;  %785 = vmatpush3.bf16.msra.mxu1 %v492_v34 }
  0x86   : > { %p964_p8 = por %p963_p3, %p962_p13 }
  0x88   : > { %p965_p9 = pnand %p964_p8, %p958_p10 }
 0x156   : > { %v360_v9 = vpop.f32.mrb[0].mxu0  ;;  %v406_v10 = vpop.f32.mrb[0].mxu1 }
 0x157   : > { %v741_v11 = vclamps-f32 %v360_v9, 1e+09  ;;  %v770_v12 = vpop.f32.mrb[1].mxu0  ;;  %v742_v13 = vclamps-f32 %v406_v10, 1e+09  ;;  %v776_v14 = vpop.f32.mrb[1].mxu1 }
 0x158   : > { %v363_v15 = vpop.f32.mrb[2].mxu0  ;;  %v409_v16 = vpop.f32.mrb[2].mxu1 }
 0x159   : > { %v771_v17 = vpop.f32.mrb[3].mxu0  ;;  %v777_v18 = vpop.f32.mrb[3].mxu1  ;;  %v417_v19 = vsel %vm416_vm2, %v741_v11, -inf  ;;  %v420_v20 = vsel %vm416_vm2, %v742_v13, -inf }
 0x15a   : > { %418 = vmax.xlane.f32.xlu0 %v417_v19 }
 0x15e   : > { %421 = vmax.xlane.f32.xlu0 %v420_v20 }
 0x1e7   : > { %v419_v21 = vpop.xlane.xlu0 %418 }
 0x1e8   : > { %v423_v22 = vsub.f32 %v741_v11, %v419_v21 }
 0x1ea   : > { %v425_v23 = vmul.f32 1.442695, %v423_v22 }
 0x1eb   : > { %v422_v24 = vpop.xlane.xlu0 %421 }
 0x1ec   : > { %857 = vpow2.f32 %v425_v23  ;;  %v424_v25 = vsub.f32 %v742_v13, %v422_v24 }
 0x1ee   : > { %v427_v26 = vmul.f32 1.442695, %v424_v25 }
 0x1f0   : > { %859 = vpow2.f32 %v427_v26 }
 0x1f6   : > { %v858_v27 = vpop.eup %857 }
 0x1f7   : > { %v429_v28 = vsel %vm416_vm2, %v858_v27, 0.0 }
 0x1f8   : > { %430 = vadd.xlane.f32.xlu1 %v429_v28 }
 0x1fa   : > { %v860_v29 = vpop.eup %859 }
 0x1fb   : > { %v432_v30 = vsel %vm416_vm2, %v860_v29, 0.0 }
 0x1fc   : > { %433 = vadd.xlane.f32.xlu1 %v432_v30 }
 0x285   : > { %v431_v35 = vpop.xlane.xlu1 %430 }
 0x286   : > { %861 = vrcp.f32 %v431_v35 }
 0x289   : > { %v434_v36 = vpop.xlane.xlu1 %433 }
 0x28a   : > { %863 = vrcp.f32 %v434_v36 }
 0x290   : > { %v862_v37 = vpop.eup %861 }
 0x291   : > { %v436_v38 = vmul.f32 %v862_v37, %v858_v27 }
 0x293   : > { %v439_v39 = vpack.c.bf16 %v436_v38, %v436_v38  ;;  %536 = vst.msk [vmem:[%s303_s20] sm:$0xff] %vm416_vm2, %v436_v38 }
 0x294   : > { %v864_v40 = vpop.eup %863 }
 0x295   : > { %v438_v41 = vmul.f32 %v864_v40, %v860_v29  ;;  %781 = vmatmul.mubr.msk.bf16.vlgmr.msra.gmra.mrb[4].mxu0 %vm416_vm2, %v439_v39 }
 0x297   : > { %v440_v42 = vpack.c.bf16 %v438_v41, %v438_v41  ;;  %537 = vst.msk [vmem:[%s303_s20 + $0x8] sm:$0xff] %vm416_vm2, %v438_v41 }
 0x299   : > { %787 = vmatmul.mubr.msk.bf16.vlgmr.msra.gmra.mrb[4].mxu1 %vm416_vm2, %v440_v42 }
 0x29a   : > { %968 = shalt.err (!%p965_p9)
}
 0x29b   : > { %s969_s5 = scalar_lea.hbm %s1331_s29, 256  ;;  %s973_s10 = scalar_lea.hbm %s1421_s4, 1024 }
 0x29c   : > { %p970_p11 = scmp.ne.s32.totalorder %s1331_s29, %s969_s5  ;;  %p974_p4 = scmp.lt.u32.totalorder %s1331_s29, %s1421_s4 }
 0x29d   : > { %p975_p1 = scmp.lt.u32.totalorder %s973_s10, %s969_s5  ;;  %p977_p12 = scmp.lt.u32.totalorder %s969_s5, %s1331_s29 }
 0x29e   : > { %p971_p7 = pnand %p970_p11, %p1443_p5 }
 0x29f   : > { %p976_p0 = por %p975_p1, %p974_p4 }
 0x2a0   : > { %p972_p2 = pneg %p971_p7 }
 0x2a1   : > { %p978_p6 = por %p977_p12, %p976_p0 }
 0x2a3   : > { %p979_p10 = pnand %p978_p6, %p972_p2 }
 0x2a5   : > { %982 = shalt.err (!%p979_p10)
}
 0x2a6   : > { %s1067_s20 = smov 128   ;;  %s1068_s22 = smov 8  }
 0x2a7   : > { %797 = dma.vmem_to_hbm [thread:$0]  (%p1443_p5), %s1324_s7, 256, %s1331_s29, %s544_s30, %s1067_s20, %s1067_s20, %s1068_s22  }
 0x2a8   : > { %s296_s9 = scalar_lea.vmem [#allocation8], %s737_s23  ;;  %s1370_s7 = scalar_lea.hbm %s1420_s3, %s756_s6 }
 0x2a9   : > { %s557_s0 = sshll.u32 %s296_s9, 4  ;;  %s539_s23 = scalar_lea.sflag [#allocation4], %s1286_s14  ;;  %s1363_s0 = int_to_ptr.vmem [resolvable:$true] %s557_s0 }
 0x2aa   : > { %s983_s29 = scalar_lea.vmem %s1363_s0, 256  ;;  %s1069_s30 = smov [#allocation8]  }
 0x2ab   : > { %p984_p13 = scmp.ne.s32.totalorder %s1363_s0, %s983_s29  ;;  %s987_s28 = sshll.u32 %s1069_s30, 4  ;;  %s988_s28 = int_to_ptr.vmem [resolvable:$false] %s987_s28 }
 0x2ac   : > { %s989_s19 = scalar_lea.vmem %s988_s28, 512  ;;  %p990_p9 = scmp.lt.s32.totalorder %s1363_s0, %s988_s28 }
 0x2ad   : > { %p985_p3 = pnand %p984_p13, %p1443_p5  ;;  %p991_p11 = scmp.lt.s32.totalorder %s989_s19, %s983_s29 }
 0x2af   : > { %p986_p8 = pneg %p985_p3  ;;  %p992_p7 = por %p991_p11, %p990_p9 }
 0x2b1   : > { %p993_p2 = pnand %p992_p7, %p986_p8 }
 0x368   : > { %v482_v43 = vpop.f32.mrb[4].mxu0 }
 0x369   : > { %534 = vst.msk [vmem:[%s296_s9] sm:$0xff] %vm319_vm1, %v482_v43  ;;  %v782_v44 = vpop.f32.mrb[5].mxu0 }
 0x36a   : > { %v485_v45 = vpop.f32.mrb[6].mxu0 }
 0x36b   : > { %v783_v46 = vpop.f32.mrb[7].mxu0 }
 0x36c   : > { %v528_v47 = vpop.f32.mrb[4].mxu1 }
 0x36d   : > { %535 = vst.msk [vmem:[%s296_s9 + $0x8] sm:$0xff] %vm319_vm1, %v528_v47  ;;  %v788_v48 = vpop.f32.mrb[5].mxu1 }
 0x36e   : > { %v531_v49 = vpop.f32.mrb[6].mxu1 }
 0x36f   : > { %996 = shalt.err (!%p993_p2)
}
 0x370   : > { %s997_s6 = scalar_lea.hbm %s1370_s7, 256  ;;  %s1001_s12 = scalar_lea.hbm %s1420_s3, 1024 }
 0x371   : > { %p998_p4 = scmp.ne.s32.totalorder %s1370_s7, %s997_s6  ;;  %p1002_p12 = scmp.lt.u32.totalorder %s1370_s7, %s1420_s3 }
 0x372   : > { %p1003_p6 = scmp.lt.u32.totalorder %s1001_s12, %s997_s6  ;;  %p1005_p13 = scmp.lt.u32.totalorder %s997_s6, %s1370_s7 }
 0x373   : > { %p999_p1 = pnand %p998_p4, %p1443_p5 }
 0x374   : > { %p1004_p10 = por %p1003_p6, %p1002_p12 }
 0x375   : > { %p1000_p0 = pneg %p999_p1 }
 0x376   : > { %p1006_p3 = por %p1005_p13, %p1004_p10 }
 0x378   : > { %p1007_p8 = pnand %p1006_p3, %p1000_p0 }
 0x37a   : > { %1010 = shalt.err (!%p1007_p8)
}
 0x37b   : > { %796 = dma.vmem_to_hbm [thread:$0]  (%p1443_p5), %s1363_s0, 256, %s1370_s7, %s539_s23, %s1067_s20, %s1067_s20, %s1068_s22   ;;  %v789_v50 = vpop.f32.mrb[7].mxu1 }
 0x37c PF: > { %p818_p9 = scmp.ge.s32.totalorder %s1057_s18, 2  ;;  %s588_s25 = sand.u32 1, %s1045_s15  }
 0x37d   : > { %p1444_p11 = scmp.ne.s32.totalorder %s1432_s27, 0  ;;  %s589_s9 = scalar_lea.sflag [#allocation4], %s588_s25 }
 0x37f   : > { %p811_p7 = pnand %p818_p9, %p1444_p11 }
 0x381   : > { %1036 = dma.done.wait (!%p811_p7), %s589_s9, 256  }
 0x382   : > { %1038 = vsyncadd (!%p811_p7), %s589_s9, 4294967040  ;;  %s598_s26 = scalar_lea.sflag [#allocation10], %s588_s25 }
 0x383   : > { %1040 = dma.done.wait (!%p811_p7), %s598_s26, 256  }
 0x384   : > { %1042 = vsyncadd (!%p811_p7), %s598_s26, 4294967040  ;;  %p24_p5 = scmp.ge.s32.totalorder %s1120_s21, 6   ;;  %s1445_s15 = smov %s1049_s16 }
 0x385   : > { %s1446_s16 = smov %s1053_s17  ;;  %s1447_s17 = smov %s1132_s24 }
 0x386   : > { %s1448_s18 = smov %s1120_s21  ;;  %26 = sbr.rel (!%p24_p5) target bundleno = 12 (0xc), region = 118 }
 0x38d   :  { %603 = vsyncpa [#allocation3], 1 }
 0x38e   :  { %605 = vsyncpa [#allocation3 + $0x1], 1 }
 0x38f   :  { %606 = vsyncpa [#allocation6], 1 }
 0x390   :  { %608 = vsyncpa [#allocation6 + $0x1], 1 }
 0x391   :  { %609 = vsyncpa [#allocation4], 1 }
 0x392   :  { %611 = vsyncpa [#allocation4 + $0x1], 1 }
 0x393   :  { %612 = vsyncpa [#allocation10], 1 }
 0x394   :  { %614 = vsyncpa [#allocation10 + $0x1], 1 }

</bundles_post_ra>
